<compile_context>
chip_gen: v7x
topology: tpu7x:2x2x1
jax: 0.10.0
libtpu: 0.0.40
codegen_flags: <defaults>
</compile_context>

<pallas_src>
import functools

import jax
import jax.numpy as jnp
from jax.experimental import pallas as pl
from jax.experimental.pallas import tpu as pltpu


def _round_up(a: int, b: int) -> int:
    return (a + b - 1) // b * b


def _model_with_loss_kernel(n_valid, x_ref, w1t_ref, b1_ref, w2_ref, b2_ref, y_ref,
                            out_ref):
    tile_n = out_ref.shape[1]

    # ---- model forward (2-layer MLP), activations kept transposed: nodes on lanes -----
    # [H, D] x [TILE_N, D] contracted over D -> [H, TILE_N]; x stays in its native layout,
    # the MXU handles the transposed RHS.  Accumulate in f32 regardless of x's dtype.
    h = jax.lax.dot_general(
        w1t_ref[...], x_ref[...],
        dimension_numbers=(((1,), (1,)), ((), ())),
        preferred_element_type=jnp.float32)                       # [H, TILE_N]  (MXU)
    h = jnp.maximum(h + b1_ref[...], 0.0)                         # bias + ReLU  (VPU, f32)

    # Second layer ([H] -> 1) as VPU broadcast-multiply + cross-sublane reduce
    # (avoids a 1-column MXU pass).
    z = jnp.sum(h * w2_ref[...], axis=0, keepdims=True) + b2_ref[...]   # [1, TILE_N]

    # ---- fused sigmoid + BCE, stable logits form, sharing exp(-|z|) --------------------
    #   sigmoid(z) = 1/(1+e^-|z|)      if z >= 0,   e^-|z|/(1+e^-|z|)  if z < 0
    #   bce(z, y)  = max(z, 0) - y*z + log1p(e^-|z|)
    a = jnp.exp(-jnp.abs(z))                                      # EUP exp (once)
    t = 1.0 + a
    inv_t = 1.0 / t
    p = jnp.where(z >= 0.0, inv_t, a * inv_t)                     # exact sigmoid(z)

    y = y_ref[...]
    bce = jnp.maximum(z, 0.0) - y * z + jnp.log1p(a)              # [1, TILE_N]

    i = pl.program_id(0)
    is_last = i == pl.num_programs(0) - 1

    # Full tiles: plain lane-dense store (no per-tile iota/mask work).
    @pl.when(jnp.logical_not(is_last))
    def _():
        out_ref[...] = jnp.concatenate([p, bce], axis=0)          # row 0: p, row 1: bce

    # Ragged last tile: zero the BCE of padded / out-of-bounds columns so the wrapper
    # mean matches torch semantics exactly (p's padded columns are sliced off outside).
    @pl.when(is_last)
    def _():
        col = i * tile_n + jax.lax.broadcasted_iota(jnp.int32, (1, tile_n), 1)
        bce_m = jnp.where(col < n_valid, bce, 0.0)
        out_ref[...] = jnp.concatenate([p, bce_m], axis=0)


def model_with_loss(x, w1, b1, w2, b2, y, *, tile_n=8192, min_tiles=4):
    """Pallas equivalent of ModelWithLoss.forward(batch) (single-device path).

    Returns (outputs, loss, loss_stats) exactly like the torch module.
    """
    n, d = x.shape
    h_dim = w1.shape[1]
    f32 = jnp.float32
    x_bytes = x.dtype.itemsize

    # ---- tile selection: lane-aligned; keep >= min_tiles tiles when N allows (feeds both
    #      v7x TensorCores and the pipeline), cap by a conservative VMEM estimate. --------
    tn = max(128, min(_round_up(int(tile_n), 128),
                      _round_up(pl.cdiv(n, min_tiles), 128)))

    def vmem_need(t):
        lane_d = _round_up(d, 128)                      # x block is lane-padded in VMEM
        return (2 * t * lane_d * x_bytes                # x, double-buffered
                + 2 * 8 * t * 4                         # y blocks (sublane-padded)
                + 2 * 8 * t * 4                         # merged output blocks
                + (h_dim + 8) * t * 4                   # h + elementwise temporaries
                + 2 * h_dim * (lane_d * x_bytes + 12))  # resident params (approx)

    while vmem_need(tn) > 24 * 2**20 and tn > 128:
        tn = _round_up(tn // 2, 128)
    need = vmem_need(tn)
    # Never request more than 32 MiB: <= default scoped limit on v6e/v7x, well under every
    # generation's physical VMEM (v7x has only 64 MiB).
    vmem_limit = None if need <= 10 * 2**20 else 32 * 2**20

    num_tiles = pl.cdiv(n, tn)
    n_pad = num_tiles * tn

    # Tiny, resident operands.  W1 is kept in x's dtype so x streams natively on the MXU
    # (bf16 x halves the dominant HBM read); all accumulation / elementwise math is f32.
    w1t = w1.astype(x.dtype).T                              # [H, D]
    b1c = b1.astype(f32).reshape(h_dim, 1)                  # [H, 1]
    w2c = w2.astype(f32).reshape(h_dim, 1)                  # [H, 1]
    b2c = b2.astype(f32).reshape(1, 1)                      # [1, 1]
    yt = y.astype(f32).reshape(1, n)                        # [1, N], lane-dense labels

    # Only if the whole problem is smaller than one tile do we pad inputs (negligible cost);
    # for multi-tile N the ragged last block is handled by Pallas OOB reads + in-kernel mask.
    if n < tn:
        x = jnp.pad(x, ((0, tn - n), (0, 0)))
        yt = jnp.pad(yt, ((0, 0), (0, tn - n)))

    kernel = functools.partial(_model_with_loss_kernel, n)

    out = pl.pallas_call(
        kernel,
        out_shape=jax.ShapeDtypeStruct((2, n_pad), f32),    # row 0: p, row 1: per-node BCE
        grid=(num_tiles,),
        in_specs=[
            pl.BlockSpec((tn, d), lambda i: (i, 0)),        # x, native [N, D], streamed
            pl.BlockSpec((h_dim, d), lambda i: (0, 0)),     # W1^T, resident in VMEM
            pl.BlockSpec((h_dim, 1), lambda i: (0, 0)),     # b1,  resident
            pl.BlockSpec((h_dim, 1), lambda i: (0, 0)),     # w2,  resident
            pl.BlockSpec((1, 1), lambda i: (0, 0)),         # b2,  resident
            pl.BlockSpec((1, tn), lambda i: (0, i)),        # y, streamed, lane-dense
        ],
        out_specs=pl.BlockSpec((2, tn), lambda i: (0, i)),
        compiler_params=pltpu.CompilerParams(
            dimension_semantics=("parallel",),              # shard node tiles across TCs (v7x)
            vmem_limit_bytes=vmem_limit,
        ),
    )(x, w1t, b1c, w2c, b2c, yt)

    outputs = out[0, :n].reshape(n, 1)                      # model outputs (probabilities)
    loss = jnp.sum(out[1]) / n                              # mean over real nodes only
    loss_stats = {"loss": loss}
    # TODO(synk): the multi-GPU branch (torch.cat of per-replica batch.y) has no
    # single-kernel analogue; only the single-device path (y = batch.y) is implemented.
    return outputs, loss, loss_stats


if __name__ == "__main__":
    D, H = 16, 32
    key = jax.random.PRNGKey(0)
    ks = jax.random.split(key, 10)

    # Deterministic parameter init (synthetic, not a checkpoint load).
    w1 = jax.random.normal(ks[0], (D, H), dtype=jnp.float32) * 0.1
    b1 = jax.random.normal(ks[1], (H,), dtype=jnp.float32) * 0.01
    w2 = jax.random.normal(ks[2], (H, 1), dtype=jnp.float32) * 0.1
    b2 = jax.random.normal(ks[3], (1,), dtype=jnp.float32) * 0.01

    def reference(x, y, w1_=w1):
        h = jnp.maximum(x @ w1_ + b1, 0.0)
        z = h @ w2 + b2
        p = jax.nn.sigmoid(z)
        bce = jnp.maximum(z, 0.0) - y * z + jnp.log1p(jnp.exp(-jnp.abs(z)))
        return p, jnp.mean(bce)

    # Case 1: tiny batch, single short tile (exercises wrapper pad + last-tile mask).
    N1 = 8
    x1 = jax.random.normal(ks[4], (N1, D), dtype=jnp.float32)
    y1 = (jax.random.uniform(ks[5], (N1, 1)) > 0.5).astype(jnp.float32)
    out1, loss1, stats1 = model_with_loss(x1, w1, b1, w2, b2, y1)
    jax.block_until_ready((out1, loss1, stats1["loss"]))
    p_ref1, l_ref1 = reference(x1, y1)
    assert out1.shape == (N1, 1)
    assert jnp.allclose(out1, p_ref1, atol=1e-5), "outputs mismatch (case 1)"
    assert jnp.allclose(loss1, l_ref1, atol=1e-5), "loss mismatch (case 1)"

    # Case 2: N not a multiple of the tile, multi-step ragged grid (pipelining + mask).
    N2 = 272
    x2 = jax.random.normal(ks[6], (N2, D), dtype=jnp.float32)
    y2 = (jax.random.uniform(ks[7], (N2, 1)) > 0.5).astype(jnp.float32)
    out2, loss2, _ = model_with_loss(x2, w1, b1, w2, b2, y2, tile_n=128)
    jax.block_until_ready((out2, loss2))
    p_ref2, l_ref2 = reference(x2, y2)
    assert jnp.allclose(out2, p_ref2, atol=1e-5), "outputs mismatch (case 2)"
    assert jnp.allclose(loss2, l_ref2, atol=1e-5), "loss mismatch (case 2)"

    # Case 3: bf16 features streamed natively on the MXU (half the HBM traffic for x),
    # f32 accumulation and elementwise math; auto tile selection (>= 4 tiles).
    N3 = 1000
    x3 = (jax.random.normal(ks[8], (N3, D), dtype=jnp.float32)).astype(jnp.bfloat16)
    y3 = (jax.random.uniform(ks[9], (N3, 1)) > 0.5).astype(jnp.float32)
    out3, loss3, _ = model_with_loss(x3, w1, b1, w2, b2, y3)
    jax.block_until_ready((out3, loss3))
    p_ref3, l_ref3 = reference(x3.astype(jnp.float32), y3,
                               w1_=w1.astype(jnp.bfloat16).astype(jnp.float32))
    assert jnp.allclose(out3, p_ref3, atol=1e-2), "outputs mismatch (case 3, bf16)"
    assert jnp.allclose(loss3, l_ref3, atol=1e-2), "loss mismatch (case 3, bf16)"

    print("KERNEL_OK")
</pallas_src>

<mosaic_0001>
module attributes {stable_mosaic.version = 11 : i64} {
  func.func @_model_with_loss_kernel(%arg0: i32, %arg1: memref<128x16xf32, #tpu.memory_space<vmem>>, %arg2: memref<32x16xf32, #tpu.memory_space<vmem>>, %arg3: memref<32x1xf32, #tpu.memory_space<vmem>>, %arg4: memref<32x1xf32, #tpu.memory_space<vmem>>, %arg5: memref<1x1xf32, #tpu.memory_space<vmem>>, %arg6: memref<1x128xf32, #tpu.memory_space<vmem>>, %arg7: memref<2x128xf32, #tpu.memory_space<vmem>>) attributes {dimension_semantics = [#tpu.dimension_semantics<parallel>], iteration_bounds = array<i64: 1>, scalar_prefetch = 0 : i64, scratch_operands = 0 : i64, tpu.core_type = #tpu.core_type<tc>, window_params = [{transform_indices = @transform_0, window_bounds = array<i64: 128, 16>}, {pipeline_mode = #tpu.pipeline_mode<synchronous>, transform_indices = @transform_1, window_bounds = array<i64: 32, 16>}, {pipeline_mode = #tpu.pipeline_mode<synchronous>, transform_indices = @transform_2, window_bounds = array<i64: 32, 1>}, {pipeline_mode = #tpu.pipeline_mode<synchronous>, transform_indices = @transform_3, window_bounds = array<i64: 32, 1>}, {pipeline_mode = #tpu.pipeline_mode<synchronous>, transform_indices = @transform_4, window_bounds = array<i64: 1, 1>}, {transform_indices = @transform_5, window_bounds = array<i64: 1, 128>}, {transform_indices = @transform_6, window_bounds = array<i64: 2, 128>}]} {
    %c0 = arith.constant 0 : index
    %c0_0 = arith.constant 0 : index
    %0 = vector.load %arg2[%c0, %c0_0] : memref<32x16xf32, #tpu.memory_space<vmem>>, vector<32x16xf32>
    %c0_1 = arith.constant 0 : index
    %c0_2 = arith.constant 0 : index
    %1 = vector.load %arg1[%c0_1, %c0_2] : memref<128x16xf32, #tpu.memory_space<vmem>>, vector<128x16xf32>
    %cst = arith.constant dense<0.000000e+00> : vector<32x128xf32>
    %2 = tpu.matmul %0, %1, %cst {dimension_numbers = #tpu.dot_dimension_numbers<[1], [1], [0], [0], [0, 0, 1, 0], [], []>} : vector<32x16xf32>, vector<128x16xf32>, vector<32x128xf32> -> vector<32x128xf32>
    %c0_3 = arith.constant 0 : index
    %c0_4 = arith.constant 0 : index
    %3 = vector.load %arg3[%c0_3, %c0_4] : memref<32x1xf32, #tpu.memory_space<vmem>>, vector<32x1xf32>
    %4 = vector.broadcast %3 : vector<32x1xf32> to vector<32x128xf32>
    %5 = arith.addf %2, %4 : vector<32x128xf32>
    %cst_5 = arith.constant 0.000000e+00 : f32
    %6 = vector.broadcast %cst_5 : f32 to vector<32x128xf32>
    %7 = arith.maximumf %5, %6 : vector<32x128xf32>
    %c0_6 = arith.constant 0 : index
    %c0_7 = arith.constant 0 : index
    %8 = vector.load %arg4[%c0_6, %c0_7] : memref<32x1xf32, #tpu.memory_space<vmem>>, vector<32x1xf32>
    %9 = vector.broadcast %8 : vector<32x1xf32> to vector<32x128xf32>
    %10 = arith.mulf %7, %9 : vector<32x128xf32>
    %cst_8 = arith.constant dense<0.000000e+00> : vector<128xf32>
    %11 = vector.multi_reduction <add>, %10, %cst_8 [0] : vector<32x128xf32> to vector<128xf32>
    %12 = vector.shape_cast %11 : vector<128xf32> to vector<1x128xf32>
    %c0_9 = arith.constant 0 : index
    %c0_10 = arith.constant 0 : index
    %13 = vector.load %arg5[%c0_9, %c0_10] : memref<1x1xf32, #tpu.memory_space<vmem>>, vector<1x1xf32>
    %14 = vector.broadcast %13 : vector<1x1xf32> to vector<1x128xf32>
    %15 = arith.addf %12, %14 : vector<1x128xf32>
    %16 = math.absf %15 : vector<1x128xf32>
    %cst_11 = arith.constant 0.000000e+00 : f32
    %17 = vector.broadcast %cst_11 : f32 to vector<1x128xf32>
    %18 = arith.subf %17, %16 : vector<1x128xf32>
    %19 = math.exp %18 : vector<1x128xf32>
    %cst_12 = arith.constant 1.000000e+00 : f32
    %20 = vector.broadcast %cst_12 : f32 to vector<1x128xf32>
    %21 = arith.addf %20, %19 : vector<1x128xf32>
    %cst_13 = arith.constant 1.000000e+00 : f32
    %22 = vector.broadcast %cst_13 : f32 to vector<1x128xf32>
    %23 = arith.divf %22, %21 : vector<1x128xf32>
    %cst_14 = arith.constant 0.000000e+00 : f32
    %24 = vector.broadcast %cst_14 : f32 to vector<1x128xf32>
    %25 = arith.cmpf oge, %15, %24 : vector<1x128xf32>
    %26 = arith.mulf %19, %23 : vector<1x128xf32>
    %27 = arith.select %25, %23, %26 : vector<1x128xi1>, vector<1x128xf32>
    %c0_15 = arith.constant 0 : index
    %c0_16 = arith.constant 0 : index
    %28 = vector.load %arg6[%c0_15, %c0_16] : memref<1x128xf32, #tpu.memory_space<vmem>>, vector<1x128xf32>
    %cst_17 = arith.constant 0.000000e+00 : f32
    %29 = vector.broadcast %cst_17 : f32 to vector<1x128xf32>
    %30 = arith.maximumf %15, %29 : vector<1x128xf32>
    %31 = arith.mulf %28, %15 : vector<1x128xf32>
    %32 = arith.subf %30, %31 : vector<1x128xf32>
    %33 = math.log1p %19 : vector<1x128xf32>
    %34 = arith.addf %32, %33 : vector<1x128xf32>
    %c0_i32 = arith.constant 0 : i32
    %35 = arith.cmpi eq, %arg0, %c0_i32 : i32
    %true = arith.constant true
    %36 = arith.xori %35, %true : i1
    %37 = arith.extui %36 : i1 to i32
    %c0_i32_18 = arith.constant 0 : i32
    %38 = arith.cmpi ne, %37, %c0_i32_18 : i32
    scf.if %38 {
      %41 = tpu.concatenate %27, %34 in 0 : vector<1x128xf32>, vector<1x128xf32> -> vector<2x128xf32>
      %c0_20 = arith.constant 0 : index
      %c0_21 = arith.constant 0 : index
      %42 = vector.load %arg7[%c0_20, %c0_21] : memref<2x128xf32, #tpu.memory_space<vmem>>, vector<2x128xf32>
      tpu.vector_store %arg7[%c0_20, %c0_21], %41 {strides = array<i32>} : memref<2x128xf32, #tpu.memory_space<vmem>>, vector<2x128xf32>,
    } else {
    }
    %39 = arith.extui %35 : i1 to i32
    %c0_i32_19 = arith.constant 0 : i32
    %40 = arith.cmpi ne, %39, %c0_i32_19 : i32
    scf.if %40 {
      %c128_i32 = arith.constant 128 : i32
      %41 = arith.muli %arg0, %c128_i32 : i32
      %42 = tpu.iota {dimensions = array<i32: 1>} : vector<1x128xi32>
      %43 = vector.broadcast %41 : i32 to vector<1x128xi32>
      %44 = arith.addi %43, %42 : vector<1x128xi32>
      %c8_i32 = arith.constant 8 : i32
      %45 = vector.broadcast %c8_i32 : i32 to vector<1x128xi32>
      %46 = arith.cmpi slt, %44, %45 : vector<1x128xi32>
      %cst_20 = arith.constant 0.000000e+00 : f32
      %47 = vector.broadcast %cst_20 : f32 to vector<1x128xf32>
      %48 = arith.select %46, %34, %47 : vector<1x128xi1>, vector<1x128xf32>
      %49 = tpu.concatenate %27, %48 in 0 : vector<1x128xf32>, vector<1x128xf32> -> vector<2x128xf32>
      %c0_21 = arith.constant 0 : index
      %c0_22 = arith.constant 0 : index
      %50 = vector.load %arg7[%c0_21, %c0_22] : memref<2x128xf32, #tpu.memory_space<vmem>>, vector<2x128xf32>
      tpu.vector_store %arg7[%c0_21, %c0_22], %49 {strides = array<i32>} : memref<2x128xf32, #tpu.memory_space<vmem>>, vector<2x128xf32>,
    } else {
    }
    return
  }
  func.func @transform_0(%arg0: i32) -> (i32, i32) {
    %c0_i32 = arith.constant 0 : i32
    %c0_i32_0 = arith.constant 0 : i32
    return %arg0, %c0_i32 : i32, i32
  }
  func.func @transform_1(%arg0: i32) -> (i32, i32) {
    %c0_i32 = arith.constant 0 : i32
    %c0_i32_0 = arith.constant 0 : i32
    %c0_i32_1 = arith.constant 0 : i32
    return %c0_i32, %c0_i32_0 : i32, i32
  }
  func.func @transform_2(%arg0: i32) -> (i32, i32) {
    %c0_i32 = arith.constant 0 : i32
    %c0_i32_0 = arith.constant 0 : i32
    %c0_i32_1 = arith.constant 0 : i32
    return %c0_i32, %c0_i32_0 : i32, i32
  }
  func.func @transform_3(%arg0: i32) -> (i32, i32) {
    %c0_i32 = arith.constant 0 : i32
    %c0_i32_0 = arith.constant 0 : i32
    %c0_i32_1 = arith.constant 0 : i32
    return %c0_i32, %c0_i32_0 : i32, i32
  }
  func.func @transform_4(%arg0: i32) -> (i32, i32) {
    %c0_i32 = arith.constant 0 : i32
    %c0_i32_0 = arith.constant 0 : i32
    %c0_i32_1 = arith.constant 0 : i32
    return %c0_i32, %c0_i32_0 : i32, i32
  }
  func.func @transform_5(%arg0: i32) -> (i32, i32) {
    %c0_i32 = arith.constant 0 : i32
    %c0_i32_0 = arith.constant 0 : i32
    return %c0_i32, %arg0 : i32, i32
  }
  func.func @transform_6(%arg0: i32) -> (i32, i32) {
    %c0_i32 = arith.constant 0 : i32
    %c0_i32_0 = arith.constant 0 : i32
    return %c0_i32, %arg0 : i32, i32
  }
}

</mosaic_0001>

<bundles_post_ra>
// kernel: tpu_custom_call.1
= control target key start
LH: loop header
LB: loop body
LE: loop exit
PB: predicated region body
PF: predicated region fallthrough
CT: control target
= control target key end

     0   :  { %s722_s0 = inlined_call_operand.vmem [shape: f32[128,16], index: 0, kind: input, shape index: {}]   ;;  %s723_s1 = inlined_call_operand.vmem [shape: f32[32,16], index: 1, kind: input, shape index: {}]   ;;  %s724_s2 = inlined_call_operand.vmem [shape: f32[32,1], index: 2, kind: input, shape index: {}]   ;;  %s725_s3 = inlined_call_operand.vmem [shape: f32[32,1], index: 3, kind: input, shape index: {}]   ;;  %s726_s4 = inlined_call_operand.<no memory space> [shape: f32[1,1], index: 4, kind: input, shape index: {}]   ;;  %s727_s5 = inlined_call_operand.vmem [shape: f32[1,128], index: 5, kind: input, shape index: {}]   ;;  %s728_s6 = inlined_call_operand.hbm [shape: f32[2,128], index: 6, kind: output, shape index: {}]  }
   0x1   :  { %v11_v0 = vstv %s726_s4 }
   0x2   :  { %12 = vst [vmem:[#allocation2] sm:$0x1] %v11_v0 }
   0x3   :  { %v30_v1 = vld [vmem:[%s722_s0] sm:$0xff]  ;;  %v31_v2 = vld [vmem:[%s722_s0 + $0x8] sm:$0xff]  ;;  %vm70_vm0 = vcmask 130048   ;;  %v32_v3 = vld [vmem:[%s722_s0 + $0x10] sm:$0xff]  ;;  %v509_v7 = vmov 0  }
   0x4   :  { %v411_v4 = vpack.c.bf16 %v31_v2, %v30_v1  ;;  %vm560_vm1 = vmpackc.low %vm70_vm0, %vm70_vm0  ;;  %v33_v6 = vld [vmem:[%s722_s0 + $0x18] sm:$0xff]  ;;  %477 = vset.pattern.permute.xlu0 %v509_v7  ;;  %478 = vset.pattern.permute.xlu1 %v509_v7  ;;  %v26_v9 = vld [vmem:[%s723_s1] sm:$0xff] }
   0x5   :  { %v417_v8 = vpack.c.bf16 %v33_v6, %v32_v3  ;;  %v34_v10 = vld [vmem:[%s722_s0 + $0x20] sm:$0xff]  ;;  %v35_v11 = vld [vmem:[%s722_s0 + $0x28] sm:$0xff]  ;;  %405 = vmatprep.mubr.msk.f32.mxu0 %vm70_vm0, %v26_v9  ;;  %v28_v12 = vld [vmem:[%s723_s1 + $0x10] sm:$0xff] }
   0x6   :  { %413 = vmatprep.subr.msk.bf16.mxu0 %vm560_vm1, %v411_v4  ;;  %459 = vmatprep.subr.msk.bf16.mxu1 %vm560_vm1, %v411_v4  ;;  %v46_v13 = vld [vmem:[%s724_s2] sm:$0xff]  ;;  %v48_v14 = vld [vmem:[%s724_s2 + $0x10] sm:$0xff]  ;;  %v423_v15 = vpack.c.bf16 %v35_v11, %v34_v10 }
   0x7   :  { %416 = vmatpush3.bf16.xpose.msk.msra.mxu0 %vm560_vm1, %v411_v4  ;;  %467 = vmatpush3.bf16.xpose.msk.msra.mxu1 %vm560_vm1, %v411_v4 }
   0x8   :  { %419 = vmatprep.subr.msk.bf16.mxu0 %vm560_vm1, %v417_v8  ;;  %460 = vmatprep.subr.msk.bf16.mxu1 %vm560_vm1, %v417_v8 }
   0x9   :  { %408 = vmatprep.mubr.msk.f32.mxu1 %vm70_vm0, %v28_v12  ;;  %52 = vperm.xlu0 %477, %v46_v13  }
   0xa   :  { %62 = vperm.xlu1 %478, %v48_v14  }
   0xb   :  { %13 = vsyncpa [#allocation4], 0  ;;  %v47_v16 = vld [vmem:[%s724_s2 + $0x8] sm:$0xff]  ;;  %v49_v17 = vld [vmem:[%s724_s2 + $0x18] sm:$0xff]  ;;  %v263_v2 = vlaneseq  ;;  %s510_s26 = smov [#allocation3]   ;;  %vm316_vm4 = vcmask 1040384  }
   0xc   :  { %v36_v18 = vld [vmem:[%s722_s0 + $0x30] sm:$0xff]  ;;  %v37_v19 = vld [vmem:[%s722_s0 + $0x38] sm:$0xff]  ;;  %v220_v20 = vld [vmem:[%s725_s3] sm:$0xff]  ;;  %s325_s27 = sshll.u32 %s510_s26, 4  ;;  %s326_s27 = int_to_ptr.vmem [resolvable:$true] %s325_s27 }
   0xd   :  { %57 = vperm.xlu0 %477, %v47_v16   ;;  %v221_v21 = vld [vmem:[%s725_s3 + $0x8] sm:$0xff]  ;;  %v429_v22 = vpack.c.bf16 %v37_v19, %v36_v18  ;;  %v222_v23 = vld [vmem:[%s725_s3 + $0x10] sm:$0xff]  ;;  %v223_v24 = vld [vmem:[%s725_s3 + $0x18] sm:$0xff]  ;;  %v264_v5 = vshrl.u32 %v263_v2, 7  ;;  %p490_p1 = scmp.lt.s32.totalorder %s326_s27, %s326_s27 }
   0xe   :  { %67 = vperm.xlu1 %478, %v49_v17   ;;  %v38_v25 = vld [vmem:[%s722_s0 + $0x40] sm:$0xff]  ;;  %v39_v26 = vld [vmem:[%s722_s0 + $0x48] sm:$0xff]  ;;  %v40_v29 = vld [vmem:[%s722_s0 + $0x50] sm:$0xff] }
   0xf   :  { %422 = vmatpush3.bf16.xpose.msk.msra.mxu0 %vm560_vm1, %v417_v8  ;;  %468 = vmatpush3.bf16.xpose.msk.msra.mxu1 %vm560_vm1, %v417_v8  ;;  %v257_v27 = vld [vmem:[#allocation2] sm:$0x1]  ;;  %v435_v28 = vpack.c.bf16 %v39_v26, %v38_v25  ;;  %v41_v30 = vld [vmem:[%s722_s0 + $0x58] sm:$0xff]  ;;  %v43_v33 = vld [vmem:[%s722_s0 + $0x68] sm:$0xff]  ;;  %v265_v8 = vsub.s32 0, %v264_v5  ;;  %v308_v26 = vand.u32 127, %v263_v2 }
  0x10   :  { %425 = vmatprep.subr.msk.bf16.mxu0 %vm560_vm1, %v423_v15  ;;  %461 = vmatprep.subr.msk.bf16.mxu1 %vm560_vm1, %v423_v15  ;;  %v441_v31 = vpack.c.bf16 %v41_v30, %v40_v29  ;;  %v42_v32 = vld [vmem:[%s722_s0 + $0x60] sm:$0xff]  ;;  %v44_v35 = vld [vmem:[%s722_s0 + $0x70] sm:$0xff]  ;;  %v45_v36 = vld [vmem:[%s722_s0 + $0x78] sm:$0xff] }
  0x11   :  { %226 = vperm.xlu0 %477, %v220_v20   ;;  %v447_v34 = vpack.c.bf16 %v43_v33, %v42_v32  ;;  %v453_v37 = vpack.c.bf16 %v45_v36, %v44_v35  ;;  %v27_v38 = vld [vmem:[%s723_s1 + $0x8] sm:$0xff]  ;;  %v29_v39 = vld [vmem:[%s723_s1 + $0x18] sm:$0xff]  ;;  %vm311_vm3 = vcmp.lt.s32.totalorder %v308_v26, 8 }
  0x12   :  { %231 = vperm.xlu1 %478, %v221_v21   ;;  %v278_v21 = vld [vmem:[%s727_s5] sm:$0x1]  ;;  %s485_s5 = scalar_lea.vmem %s326_s27, 32 }
  0x13   :  { %p486_p0 = scmp.ne.s32.totalorder %s326_s27, %s485_s5  ;;  %p491_p2 = scmp.lt.s32.totalorder %s485_s5, %s485_s5 }
  0x15   :  { %236 = vperm.xlu0 %477, %v222_v23   ;;  %p492_p3 = por %p491_p2, %p490_p1 }
  0x16   :  { %241 = vperm.xlu1 %478, %v223_v24  }
  0x17   :  { %428 = vmatpush3.bf16.xpose.msk.msra.mxu0 %vm560_vm1, %v423_v15  ;;  %469 = vmatpush3.bf16.xpose.msk.msra.mxu1 %vm560_vm1, %v423_v15  ;;  %p493_p4 = pnand %p492_p3, %p486_p0 }
  0x18   :  { %431 = vmatprep.subr.msk.bf16.mxu0 %vm560_vm1, %v429_v22  ;;  %462 = vmatprep.subr.msk.bf16.mxu1 %vm560_vm1, %v429_v22 }
  0x19   :  { %260 = vperm.xlu0 %477, %v257_v27  }
  0x1f   :  { %434 = vmatpush3.bf16.xpose.msk.msra.mxu0 %vm560_vm1, %v429_v22  ;;  %470 = vmatpush3.bf16.xpose.msk.msra.mxu1 %vm560_vm1, %v429_v22 }
  0x20   :  { %437 = vmatprep.subr.msk.bf16.mxu0 %vm560_vm1, %v435_v28  ;;  %463 = vmatprep.subr.msk.bf16.mxu1 %vm560_vm1, %v435_v28 }
  0x27   :  { %440 = vmatpush3.bf16.xpose.msk.msra.mxu0 %vm560_vm1, %v435_v28  ;;  %471 = vmatpush3.bf16.xpose.msk.msra.mxu1 %vm560_vm1, %v435_v28 }
  0x28   :  { %443 = vmatprep.subr.msk.bf16.mxu0 %vm560_vm1, %v441_v31  ;;  %464 = vmatprep.subr.msk.bf16.mxu1 %vm560_vm1, %v441_v31 }
  0x2f   :  { %446 = vmatpush3.bf16.xpose.msk.msra.mxu0 %vm560_vm1, %v441_v31  ;;  %472 = vmatpush3.bf16.xpose.msk.msra.mxu1 %vm560_vm1, %v441_v31 }
  0x30   :  { %449 = vmatprep.subr.msk.bf16.mxu0 %vm560_vm1, %v447_v34  ;;  %465 = vmatprep.subr.msk.bf16.mxu1 %vm560_vm1, %v447_v34 }
  0x37   :  { %452 = vmatpush3.bf16.xpose.msk.msra.mxu0 %vm560_vm1, %v447_v34  ;;  %473 = vmatpush3.bf16.xpose.msk.msra.mxu1 %vm560_vm1, %v447_v34 }
  0x38   :  { %455 = vmatprep.subr.msk.bf16.mxu0 %vm560_vm1, %v453_v37  ;;  %466 = vmatprep.subr.msk.bf16.mxu1 %vm560_vm1, %v453_v37 }
  0x3f   :  { %458 = vmatpush3.bf16.xpose.msk.msra.mxu0 %vm560_vm1, %v453_v37  ;;  %474 = vmatpush3.bf16.xpose.msk.msra.mxu1 %vm560_vm1, %v453_v37 }
  0x46   :  { %406 = vmatmul.mubr.msk.f32.vlgmr.msra.gmra.mrb[0].mxu0 %vm70_vm0, %v27_v38  ;;  %409 = vmatmul.mubr.msk.f32.vlgmr.msra.gmra.mrb[0].mxu1 %vm70_vm0, %v29_v39 }
  0x88   :  { %v53_v40 = vpop.permute.xlu0 %52 }
  0x89   :  { %v63_v41 = vpop.permute.xlu1 %62 }
  0x8c   :  { %v58_v42 = vpop.permute.xlu0 %57 }
  0x8d   :  { %v68_v43 = vpop.permute.xlu1 %67 }
  0x90   :  { %v227_v44 = vpop.permute.xlu0 %226 }
  0x91   :  { %v232_v53 = vpop.permute.xlu1 %231 }
  0x94   :  { %v237_v60 = vpop.permute.xlu0 %236 }
  0x95   :  { %v242_v63 = vpop.permute.xlu1 %241 }
  0x98   :  { %v261_v10 = vpop.permute.xlu0 %260 }
  0x99   :  { %v266_v12 = vrot.slane %v261_v10, %v265_v8 }
 0x119   :  { %v407_v45 = vpop.f32.mrb[0].mxu0  ;;  %v410_v46 = vpop.f32.mrb[0].mxu1 }
 0x11a   :  { %v203_v47 = vadd.f32 %v407_v45, %v58_v42  ;;  %v197_v48 = vpop.f32.mrb[1].mxu0  ;;  %v207_v49 = vpop.f32.mrb[1].mxu1  ;;  %v213_v50 = vadd.f32 %v410_v46, %v68_v43 }
 0x11b   :  { %v198_v51 = vadd.f32 %v197_v48, %v53_v40  ;;  %v208_v52 = vadd.f32 %v207_v49, %v63_v41 }
 0x11c   :  { %v217_v54 = vmax.f32 %v203_v47, 0.0  ;;  %v219_v58 = vmax.f32 %v213_v50, 0.0 }
 0x11d   :  { %v216_v55 = vmax.f32 %v198_v51, 0.0  ;;  %v218_v56 = vmax.f32 %v208_v52, 0.0 }
 0x11e   :  { %v245_v57 = vmul.f32 %v232_v53, %v217_v54  ;;  %v247_v0 = vmul.f32 %v242_v63, %v219_v58 }
 0x11f   :  { %v244_v59 = vmul.f32 %v227_v44, %v216_v55  ;;  %v246_v62 = vmul.f32 %v237_v60, %v218_v56 }
 0x121   :  { %v248_v61 = vadd.f32 %v245_v57, %v244_v59 }
 0x123   :  { %v249_v1 = vadd.f32 %v248_v61, %v246_v62 }
 0x125   :  { %v250_v3 = vadd.f32 %v249_v1, %v247_v0 }
 0x127   :  { %v251_v4 = vrot.slane %v250_v3, 4 }
 0x129   :  { %v252_v6 = vadd.f32 %v251_v4, %v250_v3 }
 0x12b   :  { %v253_v7 = vrot.slane %v252_v6, 2 }
 0x12d   :  { %v254_v9 = vadd.f32 %v253_v7, %v252_v6 }
 0x12f   :  { %v255_v11 = vrot.slane %v254_v9, 1 }
 0x131   :  { %v256_v13 = vadd.f32 %v255_v11, %v254_v9 }
 0x133   :  { %v267_v14 = vadd.f32 %v266_v12, %v256_v13 }
 0x135   :  { %v268_v15 = vand.u32 2147483647, %v267_v14  ;;  %v279_v23 = vmax.f32 %v267_v14, 0.0  ;;  %v280_v24 = vmul.f32 %v278_v21, %v267_v14  ;;  %vm275_vm5 = vcmp.ge.f32.partialorder %v267_v14, 0.0 }
 0x137   :  { %v269_v16 = vsub.f32 0.0, %v268_v15  ;;  %v281_v31 = vsub.f32 %v279_v23, %v280_v24 }
 0x139   :  { %v270_v17 = vmul.f32 1.442695, %v269_v16 }
 0x13b   :  { %479 = vpow2.f32 %v270_v17 }
 0x145   :  { %v480_v18 = vpop.eup %479 }
 0x146   :  { %v272_v19 = vadd.f32 1.0, %v480_v18  ;;  %v285_v20 = vmul.f32 -0.5, %v480_v18  ;;  %v288_v25 = vand.u32 2147483647, %v480_v18 }
 0x148   :  { %481 = vlog2.f32 %v272_v19  ;;  %v286_v22 = vadd.f32 1.0, %v285_v20  ;;  %vm289_vm2 = vcmp.lt.f32.partialorder %v288_v25, 0.0004427343 }
 0x149   :  { %483 = vrcp.f32 %v272_v19 }
 0x14a   :  { %v287_v30 = vmul.f32 %v480_v18, %v286_v22 }
 0x152   :  { %v482_v27 = vpop.eup %481 }
 0x153   :  { %v484_v28 = vpop.eup %483  ;;  %v284_v29 = vmul.f32 0.6931472, %v482_v27 }
 0x154   :  { %v276_v33 = vmul.f32 %v484_v28, %v480_v18 }
 0x155   :  { %v290_v32 = vsel %vm289_vm2, %v287_v30, %v284_v29 }
 0x156   :  { %v291_v34 = vadd.f32 %v290_v32, %v281_v31  ;;  %v277_v37 = vsel %vm275_vm5, %v484_v28, %v276_v33 }
 0x158   :  { %v312_v35 = vsel %vm311_vm3, %v291_v34, 0.0 }
 0x159   :  { %v314_v36 = vrot.slane %v312_v35, 7 }
 0x15b   :  { %v317_v38 = vsel %vm316_vm4, %v277_v37, %v314_v36 }
 0x15c   :  { %318 = vst [vmem:[#allocation3] sm:$0x3] %v317_v38 }
 0x15d   :  { %496 = shalt.err (!%p493_p4)
}
 0x15e   :  { %s497_s29 = scalar_lea.hbm %s728_s6, 32 }
 0x15f   :  { %p498_p5 = scmp.ne.s32.totalorder %s728_s6, %s497_s29  ;;  %p501_p6 = scmp.lt.u32.totalorder %s497_s29, %s728_s6 }
 0x161   :  { %p503_p7 = pnand %p501_p6, %p498_p5 }
 0x163   :  { %506 = shalt.err (!%p503_p7)
}
 0x164   :  { %328 = dma.vmem_to_hbm [thread:$0]  %s326_s27, 32, %s728_s6, [#allocation4]  }
 0x165   :  { %507 = dma.done.wait [#allocation4], 32  }
 0x166   :  { %508 = vsyncadd [#allocation4], 4294967264 }
 0x167   :  { %332 = vsyncpa [#allocation4], 1 }

</bundles_post_ra>
